<compile_context>
chip_gen: v7x
topology: tpu7x:2x2x1
jax: 0.10.0
libtpu: 0.0.40
codegen_flags: <defaults>
</compile_context>

<pallas_src>
import functools

import jax
import jax.numpy as jnp
from jax import lax
from jax.experimental import pallas as pl
from jax.experimental.pallas import tpu as pltpu


def _query_vmem_limit_bytes():
    """Per-generation scoped-VMEM limit (leaves headroom below physical)."""
    try:
        cap = int(pltpu.get_tpu_info().vmem_capacity_bytes)
    except Exception:
        cap = 64 * 1024 * 1024  # conservative fallback (v7x physical VMEM)
    return max(32 * 1024 * 1024, min(cap * 3 // 4, 100 * 1024 * 1024))


_VMEM_LIMIT_BYTES = _query_vmem_limit_bytes()


def _choose_tm(n, c, itemsize, vmem_limit):
    """Largest sublane-friendly row tile that fits the VMEM budget."""
    # Per grid step (rough): 2 double-buffered native-dtype input blocks
    # + ~4 f32 (tm, c) temporaries inside the kernel body.
    budget = vmem_limit // 2  # keep half the scoped VMEM as headroom
    per_row = c * (2 * itemsize + 4 * 4)
    tm = budget // max(per_row, 1)
    tm = int(max(16, (tm // 16) * 16))  # multiple of 16 also covers bf16 packing
    tm = min(tm, 1024)
    if tm >= n:
        return int(n)  # single full-extent block (always a legal block shape)
    return tm


def _make_kernel(n_rows, n_classes, tm, ignore_index):
    c_f = float(n_classes)

    def kernel(preds_ref, tgt_ref, out_ref):
        i = pl.program_id(0)

        x = preds_ref[...].astype(jnp.float32)                      # (TM, C)
        m = jnp.max(x, axis=-1, keepdims=True)                      # (TM, 1)
        se = jnp.sum(jnp.exp(x - m), axis=-1, keepdims=True)        # (TM, 1)
        lse = m + jnp.log(se)                                       # logsumexp per row
        row_sum_x = jnp.sum(x, axis=-1, keepdims=True)              # (TM, 1)

        # Mask rows of the (possibly partial) last block.  Use select-masking
        # (jnp.where), NOT multiply-by-mask, so garbage/NaN rows are discarded.
        row_ids = i * tm + lax.broadcasted_iota(jnp.int32, (tm, 1), 0)
        row_valid = row_ids < n_rows                                 # (TM, 1)

        # loss_1 contribution:  -sum_c log_softmax = C*lse - sum_c x
        neg_logp_sum = c_f * lse - row_sum_x
        neg_logp_sum = jnp.where(row_valid, neg_logp_sum, 0.0)

        # loss_2 contribution:  -log_softmax[target] = lse - x[target]
        tgt = tgt_ref[...]                                           # (TM, 1) int32
        col_ids = lax.broadcasted_iota(jnp.int32, (tm, n_classes), 1)
        picked_x = jnp.sum(jnp.where(col_ids == tgt, x, 0.0),
                           axis=-1, keepdims=True)                   # x[target]
        tgt_valid = jnp.logical_and(row_valid, tgt != ignore_index)
        nll = jnp.where(tgt_valid, lse - picked_x, 0.0)

        blk_sumlp = jnp.sum(neg_logp_sum)
        blk_nll = jnp.sum(nll)
        blk_cnt = jnp.sum(tgt_valid.astype(jnp.float32))

        # Lane-dense (1, 8, 128) partial-sum slab: [sumlp, nll, cnt] in lanes 0..2.
        sub = lax.broadcasted_iota(jnp.int32, (1, 8, 128), 1)
        lane = lax.broadcasted_iota(jnp.int32, (1, 8, 128), 2)
        row0 = sub == 0
        vals = jnp.where(jnp.logical_and(row0, lane == 0), blk_sumlp,
               jnp.where(jnp.logical_and(row0, lane == 1), blk_nll,
               jnp.where(jnp.logical_and(row0, lane == 2), blk_cnt, 0.0)))
        out_ref[...] = vals.astype(jnp.float32)

    return kernel


@functools.partial(jax.jit, static_argnames=("eps", "ignore_index", "tm"))
def label_smoothing_ce(preds, target, *, eps=0.1, ignore_index=-100, tm=None):
    """Pallas implementation of LabelSmoothingCE.forward with reduction='mean'."""
    n, c = preds.shape
    itemsize = jnp.dtype(preds.dtype).itemsize
    if tm is None:
        tm = _choose_tm(n, c, itemsize, _VMEM_LIMIT_BYTES)
    tm = int(min(tm, n))

    tgt2d = target.astype(jnp.int32).reshape(n, 1)
    num_blocks = pl.cdiv(n, tm)

    kernel = _make_kernel(n, c, tm, ignore_index)
    partials = pl.pallas_call(
        kernel,
        out_shape=jax.ShapeDtypeStruct((num_blocks, 8, 128), jnp.float32),
        grid_spec=pltpu.PrefetchScalarGridSpec(
            num_scalar_prefetch=0,
            grid=(num_blocks,),
            in_specs=[
                pl.BlockSpec((tm, c), lambda i: (i, 0)),   # native dtype (f32/bf16)
                pl.BlockSpec((tm, 1), lambda i: (i, 0)),   # int32 targets
            ],
            out_specs=pl.BlockSpec((1, 8, 128), lambda i: (i, 0, 0)),
        ),
        compiler_params=pltpu.CompilerParams(
            dimension_semantics=("parallel",),             # megacore-shardable on v7x
            vmem_limit_bytes=_VMEM_LIMIT_BYTES,
        ),
    )(preds, tgt2d)

    # Tiny final reduction over per-block partials (done in JAX).
    total_neg = jnp.sum(partials[:, 0, 0])
    total_nll = jnp.sum(partials[:, 0, 1])
    cnt = jnp.sum(partials[:, 0, 2])

    loss_1 = (total_neg / float(n)) * (float(eps) / float(c))
    loss_2 = total_nll / cnt  # matches torch: NaN if every target is ignored
    return loss_1 + (1.0 - float(eps)) * loss_2


def _reference(preds, target, eps=0.1, ignore_index=-100):
    logp = jax.nn.log_softmax(preds.astype(jnp.float32), axis=-1)
    c = preds.shape[-1]
    loss = (-logp.sum(axis=-1)).mean()
    loss_1 = loss * eps / c
    valid = target != ignore_index
    picked = jnp.take_along_axis(
        logp, jnp.clip(target, 0, c - 1)[:, None], axis=-1)[:, 0]
    loss_2 = jnp.sum(jnp.where(valid, -picked, 0.0)) / jnp.sum(valid)
    return loss_1 + (1.0 - eps) * loss_2


if __name__ == "__main__":
    key = jax.random.PRNGKey(0)
    k1, k2, k3, k4 = jax.random.split(key, 4)

    # Case 1: small f32, exercises ignore_index and the single-full-block path.
    N, C = 16, 32
    preds = jax.random.normal(k1, (N, C), dtype=jnp.float32)
    target = jax.random.randint(k2, (N,), 0, C, dtype=jnp.int32)
    target = target.at[3].set(-100).at[11].set(-100)

    out = label_smoothing_ce(preds, target, eps=0.1, ignore_index=-100)
    out = jax.block_until_ready(out)
    ref = _reference(preds, target, eps=0.1, ignore_index=-100)
    assert jnp.allclose(out, ref, rtol=1e-4, atol=1e-5), (out, ref)

    # Case 2: bf16 input, N not a multiple of the tile -> exercises the
    # unpadded partial-block masking path and native-dtype (bf16) reads.
    N2, C2 = 37, 128
    preds2 = jax.random.normal(k3, (N2, C2), dtype=jnp.float32).astype(jnp.bfloat16)
    target2 = jax.random.randint(k4, (N2,), 0, C2, dtype=jnp.int32)
    target2 = target2.at[0].set(-100).at[20].set(-100)

    out2 = label_smoothing_ce(preds2, target2, eps=0.1, ignore_index=-100, tm=16)
    out2 = jax.block_until_ready(out2)
    ref2 = _reference(preds2.astype(jnp.float32), target2, eps=0.1, ignore_index=-100)
    assert jnp.allclose(out2, ref2, rtol=1e-3, atol=1e-4), (out2, ref2)

    print("KERNEL_OK")
</pallas_src>

<mosaic_0001>
module attributes {stable_mosaic.version = 11 : i64} {
  func.func @kernel(%arg0: i32, %arg1: memref<16x32xf32, #tpu.memory_space<vmem>>, %arg2: memref<16x1xi32, #tpu.memory_space<vmem>>, %arg3: memref<1x8x128xf32, #tpu.memory_space<vmem>>) attributes {dimension_semantics = [#tpu.dimension_semantics<parallel>], iteration_bounds = array<i64: 1>, scalar_prefetch = 0 : i64, scratch_operands = 0 : i64, tpu.core_type = #tpu.core_type<tc>, window_params = [{transform_indices = @transform_0, window_bounds = array<i64: 16, 32>}, {transform_indices = @transform_1, window_bounds = array<i64: 16, 1>}, {transform_indices = @transform_2, window_bounds = array<i64: 1, 8, 128>}]} {
    %c0 = arith.constant 0 : index
    %c0_0 = arith.constant 0 : index
    %0 = vector.load %arg1[%c0, %c0_0] : memref<16x32xf32, #tpu.memory_space<vmem>>, vector<16x32xf32>
    %cst = arith.constant dense<0xFF800000> : vector<16xf32>
    %1 = vector.multi_reduction <maximumf>, %0, %cst [1] : vector<16x32xf32> to vector<16xf32>
    %2 = vector.shape_cast %1 : vector<16xf32> to vector<16x1xf32>
    %3 = vector.broadcast %2 : vector<16x1xf32> to vector<16x32xf32>
    %4 = arith.subf %0, %3 : vector<16x32xf32>
    %5 = math.exp %4 : vector<16x32xf32>
    %cst_1 = arith.constant dense<0.000000e+00> : vector<16xf32>
    %6 = vector.multi_reduction <add>, %5, %cst_1 [1] : vector<16x32xf32> to vector<16xf32>
    %7 = vector.shape_cast %6 : vector<16xf32> to vector<16x1xf32>
    %8 = math.log %7 : vector<16x1xf32>
    %9 = arith.addf %2, %8 : vector<16x1xf32>
    %cst_2 = arith.constant dense<0.000000e+00> : vector<16xf32>
    %10 = vector.multi_reduction <add>, %0, %cst_2 [1] : vector<16x32xf32> to vector<16xf32>
    %11 = vector.shape_cast %10 : vector<16xf32> to vector<16x1xf32>
    %c16_i32 = arith.constant 16 : i32
    %12 = arith.muli %arg0, %c16_i32 : i32
    %13 = tpu.iota {dimensions = array<i32: 0>} : vector<16x1xi32>
    %14 = vector.broadcast %12 : i32 to vector<16x1xi32>
    %15 = arith.addi %14, %13 : vector<16x1xi32>
    %c16_i32_3 = arith.constant 16 : i32
    %16 = vector.broadcast %c16_i32_3 : i32 to vector<16x1xi32>
    %17 = arith.cmpi slt, %15, %16 : vector<16x1xi32>
    %cst_4 = arith.constant 3.200000e+01 : f32
    %18 = vector.broadcast %cst_4 : f32 to vector<16x1xf32>
    %19 = arith.mulf %18, %9 : vector<16x1xf32>
    %20 = arith.subf %19, %11 : vector<16x1xf32>
    %cst_5 = arith.constant 0.000000e+00 : f32
    %21 = vector.broadcast %cst_5 : f32 to vector<16x1xf32>
    %22 = arith.select %17, %20, %21 : vector<16x1xi1>, vector<16x1xf32>
    %c0_6 = arith.constant 0 : index
    %c0_7 = arith.constant 0 : index
    %23 = vector.load %arg2[%c0_6, %c0_7] : memref<16x1xi32, #tpu.memory_space<vmem>>, vector<16x1xi32>
    %24 = tpu.iota {dimensions = array<i32: 1>} : vector<16x32xi32>
    %25 = vector.broadcast %23 : vector<16x1xi32> to vector<16x32xi32>
    %26 = arith.cmpi eq, %24, %25 : vector<16x32xi32>
    %cst_8 = arith.constant 0.000000e+00 : f32
    %27 = vector.broadcast %cst_8 : f32 to vector<16x32xf32>
    %28 = arith.select %26, %0, %27 : vector<16x32xi1>, vector<16x32xf32>
    %cst_9 = arith.constant dense<0.000000e+00> : vector<16xf32>
    %29 = vector.multi_reduction <add>, %28, %cst_9 [1] : vector<16x32xf32> to vector<16xf32>
    %30 = vector.shape_cast %29 : vector<16xf32> to vector<16x1xf32>
    %c-100_i32 = arith.constant -100 : i32
    %31 = vector.broadcast %c-100_i32 : i32 to vector<16x1xi32>
    %32 = arith.cmpi ne, %23, %31 : vector<16x1xi32>
    %33 = arith.andi %17, %32 : vector<16x1xi1>
    %34 = arith.subf %9, %30 : vector<16x1xf32>
    %cst_10 = arith.constant 0.000000e+00 : f32
    %35 = vector.broadcast %cst_10 : f32 to vector<16x1xf32>
    %36 = arith.select %33, %34, %35 : vector<16x1xi1>, vector<16x1xf32>
    %37 = vector.shape_cast %22 : vector<16x1xf32> to vector<1x16x1xf32>
    %cst_11 = arith.constant dense<0.000000e+00> : vector<1xf32>
    %38 = vector.multi_reduction <add>, %37, %cst_11 [1, 2] : vector<1x16x1xf32> to vector<1xf32>
    %39 = vector.shape_cast %38 : vector<1xf32> to vector<1x1x1xf32>
    %40 = vector.extract %39[0, 0, 0] : f32 from vector<1x1x1xf32>
    %41 = vector.shape_cast %36 : vector<16x1xf32> to vector<1x16x1xf32>
    %cst_12 = arith.constant dense<0.000000e+00> : vector<1xf32>
    %42 = vector.multi_reduction <add>, %41, %cst_12 [1, 2] : vector<1x16x1xf32> to vector<1xf32>
    %43 = vector.shape_cast %42 : vector<1xf32> to vector<1x1x1xf32>
    %44 = vector.extract %43[0, 0, 0] : f32 from vector<1x1x1xf32>
    %45 = arith.extui %33 : vector<16x1xi1> to vector<16x1xi32>
    %46 = arith.sitofp %45 : vector<16x1xi32> to vector<16x1xf32>
    %47 = vector.shape_cast %46 : vector<16x1xf32> to vector<1x16x1xf32>
    %cst_13 = arith.constant dense<0.000000e+00> : vector<1xf32>
    %48 = vector.multi_reduction <add>, %47, %cst_13 [1, 2] : vector<1x16x1xf32> to vector<1xf32>
    %49 = vector.shape_cast %48 : vector<1xf32> to vector<1x1x1xf32>
    %50 = vector.extract %49[0, 0, 0] : f32 from vector<1x1x1xf32>
    %51 = tpu.iota {dimensions = array<i32: 1>} : vector<1x8x128xi32>
    %52 = tpu.iota {dimensions = array<i32: 2>} : vector<1x8x128xi32>
    %c0_i32 = arith.constant 0 : i32
    %53 = vector.broadcast %c0_i32 : i32 to vector<1x8x128xi32>
    %54 = arith.cmpi eq, %51, %53 : vector<1x8x128xi32>
    %c0_i32_14 = arith.constant 0 : i32
    %55 = vector.broadcast %c0_i32_14 : i32 to vector<1x8x128xi32>
    %56 = arith.cmpi eq, %52, %55 : vector<1x8x128xi32>
    %57 = arith.andi %54, %56 : vector<1x8x128xi1>
    %c1_i32 = arith.constant 1 : i32
    %58 = vector.broadcast %c1_i32 : i32 to vector<1x8x128xi32>
    %59 = arith.cmpi eq, %52, %58 : vector<1x8x128xi32>
    %60 = arith.andi %54, %59 : vector<1x8x128xi1>
    %c2_i32 = arith.constant 2 : i32
    %61 = vector.broadcast %c2_i32 : i32 to vector<1x8x128xi32>
    %62 = arith.cmpi eq, %52, %61 : vector<1x8x128xi32>
    %63 = arith.andi %54, %62 : vector<1x8x128xi1>
    %cst_15 = arith.constant 0.000000e+00 : f32
    %64 = vector.broadcast %50 : f32 to vector<1x8x128xf32>
    %65 = vector.broadcast %cst_15 : f32 to vector<1x8x128xf32>
    %66 = arith.select %63, %64, %65 : vector<1x8x128xi1>, vector<1x8x128xf32>
    %67 = vector.broadcast %44 : f32 to vector<1x8x128xf32>
    %68 = arith.select %60, %67, %66 : vector<1x8x128xi1>, vector<1x8x128xf32>
    %69 = vector.broadcast %40 : f32 to vector<1x8x128xf32>
    %70 = arith.select %57, %69, %68 : vector<1x8x128xi1>, vector<1x8x128xf32>
    %c0_16 = arith.constant 0 : index
    %c0_17 = arith.constant 0 : index
    %c0_18 = arith.constant 0 : index
    %71 = vector.load %arg3[%c0_16, %c0_17, %c0_18] : memref<1x8x128xf32, #tpu.memory_space<vmem>>, vector<1x8x128xf32>
    tpu.vector_store %arg3[%c0_16, %c0_17, %c0_18], %70 {strides = array<i32>} : memref<1x8x128xf32, #tpu.memory_space<vmem>>, vector<1x8x128xf32>,
    return
  }
  func.func @transform_0(%arg0: i32) -> (i32, i32) {
    %c0_i32 = arith.constant 0 : i32
    %c0_i32_0 = arith.constant 0 : i32
    return %arg0, %c0_i32 : i32, i32
  }
  func.func @transform_1(%arg0: i32) -> (i32, i32) {
    %c0_i32 = arith.constant 0 : i32
    %c0_i32_0 = arith.constant 0 : i32
    return %arg0, %c0_i32 : i32, i32
  }
  func.func @transform_2(%arg0: i32) -> (i32, i32, i32) {
    %c0_i32 = arith.constant 0 : i32
    %c0_i32_0 = arith.constant 0 : i32
    %c0_i32_1 = arith.constant 0 : i32
    return %arg0, %c0_i32, %c0_i32_0 : i32, i32, i32
  }
}

</mosaic_0001>

<bundles_post_ra>
// kernel: label_smoothing_ce.1
= control target key start
LH: loop header
LB: loop body
LE: loop exit
PB: predicated region body
PF: predicated region fallthrough
CT: control target
= control target key end

     0   :  { %vm13_vm0 = vcmask 261120   ;;  %v166_v2 = vmov 0   ;;  %v45_v11 = vlaneseq  ;;  %v167_v27 = vmov 0.0   ;;  %s237_s0 = inlined_call_operand.vmem [shape: f32[16,32], index: 0, kind: input, shape index: {}]   ;;  %s238_s1 = inlined_call_operand.vmem [shape: s32[16,1], index: 1, kind: input, shape index: {}]   ;;  %s239_s2 = inlined_call_operand.vmem [shape: f32[1,8,128], index: 2, kind: output, shape index: {}]  }
   0x1   :  { %v11_v0 = vld [vmem:[%s237_s0] sm:$0xff]  ;;  %v12_v1 = vld [vmem:[%s237_s0 + $0x8] sm:$0xff]  ;;  %156 = vset.pattern.permute.xlu1 %v166_v2  ;;  %157 = vset.pattern.permute.xlu0 %v166_v2  ;;  %vm87_vm5 = vcmask 7168  }
   0x2   :  { %v192_v3 = vld [vmem:[%s238_s1] sm:$0xff]  ;;  %v14_v4 = vsel %vm13_vm0, %v11_v0, -inf  ;;  %v199_v5 = vld [vmem:[%s238_s1 + $0x8] sm:$0xff]  ;;  %v17_v6 = vsel %vm13_vm0, %v12_v1, -inf  ;;  %v204_v15 = vand.u32 127, %v45_v11  ;;  %v38_v25 = vsel %vm13_vm0, %v11_v0, 0.0 }
   0x3   :  { %64 = vperm.xlu1 %156, %v192_v3   ;;  %15 = vmax.xlane.f32.xlu0 %v14_v4  ;;  %v41_v26 = vsel %vm13_vm0, %v12_v1, 0.0  ;;  %vm79_vm3 = vcmp.ne.s32.totalorder %v192_v3, 4294967196  ;;  %vm80_vm4 = vcmp.ne.s32.totalorder %v199_v5, 4294967196 }
   0x4   :  { %v146_v28 = vsel %vm79_vm3, 1.0, %v167_v27  ;;  %v147_v29 = vsel %vm80_vm4, 1.0, %v167_v27  ;;  %vm133_vm7 = vcmp.eq.s32.totalorder %v204_v15, 2  ;;  %vm131_vm8 = vcmp.eq.s32.totalorder %v204_v15, 1 }
   0x5   :  { %v116_v30 = vsel %vm87_vm5, %v146_v28, 0.0  ;;  %v117_v31 = vsel %vm87_vm5, %v147_v29, 0.0  ;;  %vm129_vm9 = vcmp.eq.s32.totalorder %v204_v15, 0 }
   0x6   :  { %v118_v32 = vadd.f32 %v117_v31, %v116_v30 }
   0x7   :  { %67 = vperm.xlu1 %156, %v199_v5   ;;  %18 = vmax.xlane.f32.xlu0 %v17_v6 }
  0x82   :  { %v65_v14 = vpop.permute.xlu1 %64 }
  0x83   :  { %vm69_vm1 = vcmp.eq.s32.totalorder %v204_v15, %v65_v14 }
  0x84   :  { %v71_v18 = vsel %vm69_vm1, %v11_v0, 0.0 }
  0x85   :  { %v73_v20 = vsel %vm13_vm0, %v71_v18, 0.0  ;;  %v46_v18 = vshrl.u32 %v45_v11, 7 }
  0x86   :  { %v68_v16 = vpop.permute.xlu1 %67 }
  0x87   :  { %vm70_vm2 = vcmp.eq.s32.totalorder %v204_v15, %v68_v16  ;;  %vm128_vm6 = vcmp.eq.s32.totalorder %v46_v18, 0 }
  0x88   :  { %v72_v22 = vsel %vm70_vm2, %v12_v1, 0.0  ;;  %vm134_vm10 = vmand %vm128_vm6, %vm133_vm7 }
  0x89   :  { %v76_v24 = vsel %vm13_vm0, %v72_v22, 0.0  ;;  %vm132_vm11 = vmand %vm128_vm6, %vm131_vm8 }
  0x8a   :  { %vm130_vm12 = vmand %vm128_vm6, %vm129_vm9 }
  0x90   :  { %v16_v7 = vpop.xlane.xlu0 %15 }
  0x91   :  { %v20_v8 = vsub.f32 %v11_v0, %v16_v7 }
  0x93   :  { %v22_v9 = vmul.f32 1.442695, %v20_v8 }
  0x94   :  { %v19_v10 = vpop.xlane.xlu0 %18 }
  0x95   :  { %158 = vpow2.f32 %v22_v9  ;;  %v21_v12 = vsub.f32 %v12_v1, %v19_v10 }
  0x97   :  { %v24_v13 = vmul.f32 1.442695, %v21_v12 }
  0x99   :  { %160 = vpow2.f32 %v24_v13 }
  0x9f   :  { %v159_v17 = vpop.eup %158 }
  0xa0   :  { %v26_v19 = vsel %vm13_vm0, %v159_v17, 0.0 }
  0xa1   :  { %27 = vadd.xlane.f32.xlu0 %v26_v19 }
  0xa3   :  { %v161_v21 = vpop.eup %160 }
  0xa4   :  { %v29_v23 = vsel %vm13_vm0, %v161_v21, 0.0 }
  0xa5   :  { %30 = vadd.xlane.f32.xlu1 %v29_v23  ;;  %74 = vadd.xlane.f32.xlu0 %v73_v20 }
  0xa9   :  { %77 = vadd.xlane.f32.xlu0 %v76_v24 }
  0xad   :  { %39 = vadd.xlane.f32.xlu0 %v38_v25 }
  0xb1   :  { %42 = vadd.xlane.f32.xlu0 %v41_v26 }
 0x12e   :  { %v28_v33 = vpop.xlane.xlu0 %27 }
 0x12f   :  { %162 = vlog2.f32 %v28_v33 }
 0x132   :  { %v31_v34 = vpop.xlane.xlu1 %30  ;;  %v75_v35 = vpop.xlane.xlu0 %74 }
 0x133   :  { %164 = vlog2.f32 %v31_v34 }
 0x136   :  { %v78_v36 = vpop.xlane.xlu0 %77 }
 0x139   :  { %v163_v37 = vpop.eup %162 }
 0x13a   :  { %v33_v38 = vmul.f32 0.6931472, %v163_v37  ;;  %v40_v39 = vpop.xlane.xlu0 %39 }
 0x13c   :  { %v36_v40 = vadd.f32 %v33_v38, %v16_v7 }
 0x13d   :  { %v165_v41 = vpop.eup %164 }
 0x13e   :  { %v35_v42 = vmul.f32 0.6931472, %v165_v41  ;;  %v83_v43 = vsub.f32 %v36_v40, %v75_v35  ;;  %v53_v45 = vmul.f32 32.0, %v36_v40  ;;  %v43_v46 = vpop.xlane.xlu0 %42 }
 0x140   :  { %v37_v44 = vadd.f32 %v35_v42, %v19_v10  ;;  %v85_v47 = vsel %vm79_vm3, %v83_v43, 0.0  ;;  %v55_v52 = vsub.f32 %v53_v45, %v40_v39 }
 0x141   :  { %v100_v53 = vsel %vm87_vm5, %v85_v47, 0.0 }
 0x142   :  { %v84_v48 = vsub.f32 %v37_v44, %v78_v36  ;;  %v54_v49 = vmul.f32 32.0, %v37_v44  ;;  %v88_v57 = vsel %vm87_vm5, %v55_v52, 0.0 }
 0x144   :  { %v86_v50 = vsel %vm80_vm4, %v84_v48, 0.0  ;;  %v56_v51 = vsub.f32 %v54_v49, %v43_v46 }
 0x145   :  { %v101_v54 = vsel %vm87_vm5, %v86_v50, 0.0 }
 0x146   :  { %v102_v55 = vadd.f32 %v101_v54, %v100_v53  ;;  %v89_v56 = vsel %vm87_vm5, %v56_v51, 0.0 }
 0x147   :  { %v90_v58 = vadd.f32 %v89_v56, %v88_v57 }
 0x148   :  { %103 = vadd.xlane.f32.xlu0 %v102_v55 }
 0x14c   :  { %91 = vadd.xlane.f32.xlu0 %v90_v58 }
 0x150   :  { %119 = vadd.xlane.f32.xlu0 %v118_v32 }
 0x1d5   :  { %v104_v59 = vpop.xlane.xlu0 %103 }
 0x1d6   :  { %v105_v60 = vrot.slane %v104_v59, 4 }
 0x1d8   :  { %v106_v61 = vadd.f32 %v105_v60, %v104_v59 }
 0x1d9   :  { %v92_v62 = vpop.xlane.xlu0 %91 }
 0x1da   :  { %v107_v63 = vrot.slane %v106_v61, 2  ;;  %v93_v0 = vrot.slane %v92_v62, 4 }
 0x1dc   :  { %v94_v1 = vadd.f32 %v93_v0, %v92_v62  ;;  %v108_v3 = vadd.f32 %v107_v63, %v106_v61 }
 0x1dd   :  { %v120_v2 = vpop.xlane.xlu0 %119 }
 0x1de   :  { %v95_v4 = vrot.slane %v94_v1, 2  ;;  %v121_v5 = vrot.slane %v120_v2, 4  ;;  %v109_v8 = vrot.slane %v108_v3, 1 }
 0x1e0   :  { %v122_v6 = vadd.f32 %v121_v5, %v120_v2  ;;  %v96_v7 = vadd.f32 %v95_v4, %v94_v1  ;;  %v110_v14 = vadd.f32 %v109_v8, %v108_v3 }
 0x1e2   :  { %v123_v9 = vrot.slane %v122_v6, 2  ;;  %v97_v10 = vrot.slane %v96_v7, 1 }
 0x1e4   :  { %v124_v12 = vadd.f32 %v123_v9, %v122_v6  ;;  %v98_v13 = vadd.f32 %v97_v10, %v96_v7 }
 0x1e6   :  { %148 = vpush %v98_v13  ;;  %v125_v16 = vrot.slane %v124_v12, 1 }
 0x1e7   :  { %150 = vpush %v110_v14 }
 0x1e8   :  { %v126_v17 = vadd.f32 %v125_v16, %v124_v12 }
 0x1ea   :  { %152 = vpush %v126_v17 }
 0x217   :  { %s149_s0 = spop %148 }
 0x218   :  { %s151_s1 = spop %150  ;;  %v139_v22 = vstv %s149_s0 }
 0x219   :  { %v137_v20 = vstv %s151_s1 }
 0x21b   :  { %s153_s17 = spop %152 }
 0x21c   :  { %v135_v19 = vstv %s153_s17 }
 0x21d   :  { %v136_v21 = vsel %vm134_vm10, %v135_v19, 0.0 }
 0x21e   :  { %v138_v23 = vsel %vm132_vm11, %v137_v20, %v136_v21 }
 0x21f   :  { %v140_v24 = vsel %vm130_vm12, %v139_v22, %v138_v23 }
 0x220   :  { %141 = vst [vmem:[%s239_s2] sm:$0xff] %v140_v24 }

</bundles_post_ra>
